<compile_context>
chip_gen: v7x
topology: tpu7x:2x2x1
jax: 0.10.0
libtpu: 0.0.40
codegen_flags: <defaults>
</compile_context>

<pallas_src>
import jax
import jax.numpy as jnp
from jax.experimental import pallas as pl
from jax.experimental.pallas import tpu as pltpu


def _senet_kernel(x_ref, p1_ref, b1_ref, w2t_ref, b2_ref, bcast_ref, o_ref):
    # x_ref    : (TB, F*E)  lane-dense input slab
    # p1_ref   : (F*E, T)   fused pooling(1/E) @ W1^T
    # b1_ref   : (1, T),  w2t_ref: (T, F),  b2_ref: (1, F)
    # bcast_ref: (F, F*E)   block-diag ones -> broadcast gate over E

    # (1)+(2a) squeeze fused into the first excitation Linear + sigmoid.
    h = jax.nn.sigmoid(
        jnp.dot(x_ref[...], p1_ref[...], preferred_element_type=jnp.float32)
        + b1_ref[...].astype(jnp.float32))                          # (TB, T)

    # (2b) second excitation Linear + sigmoid (EUP).
    a = jax.nn.sigmoid(
        jnp.dot(h.astype(w2t_ref.dtype), w2t_ref[...],
                preferred_element_type=jnp.float32)
        + b2_ref[...].astype(jnp.float32))                          # (TB, F)

    # (3) broadcast the per-field gate over E via MXU, then re-weight.
    gate = jnp.dot(a.astype(bcast_ref.dtype), bcast_ref[...],
                   preferred_element_type=jnp.float32)              # (TB, FE)

    # Re-read x_ref here (no long live range across the matmul chain); the
    # multiply runs in the IO dtype.
    o_ref[...] = x_ref[...] * gate.astype(o_ref.dtype)


def _round_up(v, m):
    return ((v + m - 1) // m) * m


def senet_layer(x, w1, b1, w2, b2, *, tb=1024):
    """SENET layer.

    x : (B, F, E)
    w1: (T, F), b1: (T,)   -- first Linear (num_fields -> temp_dim)
    w2: (F, T), b2: (F,)   -- second Linear (temp_dim -> num_fields)
    returns (B, F, E)
    """
    B, F, E = x.shape
    T = w1.shape[0]
    FE = F * E
    dt = x.dtype
    itemsize = jnp.dtype(dt).itemsize
    sub = 16 if dt == jnp.bfloat16 else 8

    # Free, contiguous reshape: lane-dense (B, F*E) view of the input.
    x_flat = x.reshape(B, FE)

    # Fused constant: pooling (mean over E) folded into W1^T, built in f32 and
    # cast once (avoids the bf16 1/E rounding concern and removes one matmul).
    pool = (jnp.kron(jnp.eye(F, dtype=jnp.float32),
                     jnp.ones((E, 1), dtype=jnp.float32)) / E)           # (FE, F)
    p1 = jnp.dot(pool, jnp.transpose(w1).astype(jnp.float32)).astype(dt)  # (FE, T)
    bcast = jnp.kron(jnp.eye(F, dtype=jnp.float32),
                     jnp.ones((1, E), dtype=jnp.float32)).astype(dt)      # (F, FE)
    b1r = b1.reshape(1, T).astype(dt)
    w2t = jnp.transpose(w2).astype(dt)                                    # (T, F)
    b2r = b2.reshape(1, F).astype(dt)

    # Batch tiling: >=2 grid steps when the batch allows (v7x 2 TCs +
    # pipelining), rounded to the sublane grid, capped at `tb` rows.
    if B >= 2 * sub:
        TB = min(_round_up(-(-B // 2), sub), _round_up(tb, sub))
    else:
        TB = _round_up(B, sub)
    TB = min(TB, _round_up(B, sub))
    grid_steps = -(-B // TB)

    block_bytes = TB * FE * itemsize
    const_bytes = (FE * T + T + T * F + F + F * FE) * itemsize
    vmem_bytes = int(min(4 * block_bytes + 8 * const_bytes + (4 << 20), 48 << 20))

    cost = pl.CostEstimate(
        flops=int(2 * B * FE * T + 2 * B * T * F + 2 * B * F * FE + B * FE),
        transcendentals=int(B * (T + F)),
        bytes_accessed=int(2 * B * FE * itemsize + const_bytes),
    )

    out_flat = pl.pallas_call(
        _senet_kernel,
        out_shape=jax.ShapeDtypeStruct((B, FE), dt),
        grid_spec=pltpu.PrefetchScalarGridSpec(
            num_scalar_prefetch=0,
            grid=(grid_steps,),
            in_specs=[
                pl.BlockSpec((TB, FE), lambda i: (i, 0)),   # x tile (streamed)
                pl.BlockSpec((FE, T), lambda i: (0, 0)),    # fused pool @ W1^T
                pl.BlockSpec((1, T), lambda i: (0, 0)),     # b1
                pl.BlockSpec((T, F), lambda i: (0, 0)),     # W2^T
                pl.BlockSpec((1, F), lambda i: (0, 0)),     # b2
                pl.BlockSpec((F, FE), lambda i: (0, 0)),    # gate broadcast
            ],
            out_specs=pl.BlockSpec((TB, FE), lambda i: (i, 0)),
        ),
        compiler_params=pltpu.CompilerParams(
            dimension_semantics=("parallel",),
            vmem_limit_bytes=vmem_bytes),
        cost_estimate=cost,
    )(x_flat, p1, b1r, w2t, b2r, bcast)

    return out_flat.reshape(B, F, E)


if __name__ == "__main__":
    # Small shapes consistent with the module: batch=8, num_fields=12,
    # embed_dim=32, ratio=3 -> temp_dim=4.
    B, F, E, ratio = 8, 12, 32, 3
    T = F // ratio

    key = jax.random.PRNGKey(0)
    k_x, k_w1, k_b1, k_w2, k_b2 = jax.random.split(key, 5)

    x = jax.random.normal(k_x, (B, F, E), jnp.float32)
    # PyTorch-Linear-style uniform init bounds (deterministic).
    lim1 = 1.0 / (F ** 0.5)
    lim2 = 1.0 / (T ** 0.5)
    w1 = jax.random.uniform(k_w1, (T, F), jnp.float32, minval=-lim1, maxval=lim1)
    b1 = jax.random.uniform(k_b1, (T,), jnp.float32, minval=-lim1, maxval=lim1)
    w2 = jax.random.uniform(k_w2, (F, T), jnp.float32, minval=-lim2, maxval=lim2)
    b2 = jax.random.uniform(k_b2, (F,), jnp.float32, minval=-lim2, maxval=lim2)

    out = senet_layer(x, w1, b1, w2, b2)
    out = jax.block_until_ready(out)

    # Pure-JAX reference mirroring the PyTorch forward exactly.
    z_mean = jnp.mean(x, axis=2, keepdims=True)                  # (B, F, 1)
    z = jnp.transpose(z_mean, (0, 2, 1))                         # (B, 1, F)
    h = jax.nn.sigmoid(jnp.einsum("bif,tf->bit", z, w1) + b1)    # (B, 1, T)
    a = jax.nn.sigmoid(jnp.einsum("bit,ft->bif", h, w2) + b2)    # (B, 1, F)
    a_t = jnp.transpose(a, (0, 2, 1))                            # (B, F, 1)
    ref = a_t * x

    assert out.shape == (B, F, E)
    assert jnp.allclose(out, ref, atol=1e-5, rtol=1e-5)
    print("KERNEL_OK")
</pallas_src>

<mosaic_0001>
module attributes {stable_mosaic.version = 11 : i64} {
  func.func @_senet_kernel(%arg0: i32, %arg1: memref<8x384xf32, #tpu.memory_space<vmem>>, %arg2: memref<384x4xf32, #tpu.memory_space<vmem>>, %arg3: memref<1x4xf32, #tpu.memory_space<vmem>>, %arg4: memref<4x12xf32, #tpu.memory_space<vmem>>, %arg5: memref<1x12xf32, #tpu.memory_space<vmem>>, %arg6: memref<12x384xf32, #tpu.memory_space<vmem>>, %arg7: memref<8x384xf32, #tpu.memory_space<vmem>>) attributes {dimension_semantics = [#tpu.dimension_semantics<parallel>], iteration_bounds = array<i64: 1>, scalar_prefetch = 0 : i64, scratch_operands = 0 : i64, tpu.core_type = #tpu.core_type<tc>, window_params = [{transform_indices = @transform_0, window_bounds = array<i64: 8, 384>}, {pipeline_mode = #tpu.pipeline_mode<synchronous>, transform_indices = @transform_1, window_bounds = array<i64: 384, 4>}, {pipeline_mode = #tpu.pipeline_mode<synchronous>, transform_indices = @transform_2, window_bounds = array<i64: 1, 4>}, {pipeline_mode = #tpu.pipeline_mode<synchronous>, transform_indices = @transform_3, window_bounds = array<i64: 4, 12>}, {pipeline_mode = #tpu.pipeline_mode<synchronous>, transform_indices = @transform_4, window_bounds = array<i64: 1, 12>}, {pipeline_mode = #tpu.pipeline_mode<synchronous>, transform_indices = @transform_5, window_bounds = array<i64: 12, 384>}, {transform_indices = @transform_6, window_bounds = array<i64: 8, 384>}]} {
    %c0 = arith.constant 0 : index
    %c0_0 = arith.constant 0 : index
    %0 = vector.load %arg1[%c0, %c0_0] : memref<8x384xf32, #tpu.memory_space<vmem>>, vector<8x384xf32>
    %c0_1 = arith.constant 0 : index
    %c0_2 = arith.constant 0 : index
    %1 = vector.load %arg2[%c0_1, %c0_2] : memref<384x4xf32, #tpu.memory_space<vmem>>, vector<384x4xf32>
    %cst = arith.constant dense<0.000000e+00> : vector<8x4xf32>
    %2 = tpu.matmul %0, %1, %cst {dimension_numbers = #tpu.dot_dimension_numbers<[1], [0], [0], [1], [0, 0, 1, 1], [], []>} : vector<8x384xf32>, vector<384x4xf32>, vector<8x4xf32> -> vector<8x4xf32>
    %c0_3 = arith.constant 0 : index
    %c0_4 = arith.constant 0 : index
    %3 = vector.load %arg3[%c0_3, %c0_4] : memref<1x4xf32, #tpu.memory_space<vmem>>, vector<1x4xf32>
    %4 = vector.broadcast %3 : vector<1x4xf32> to vector<8x4xf32>
    %5 = arith.addf %2, %4 : vector<8x4xf32>
    %6 = arith.negf %5 : vector<8x4xf32>
    %7 = math.exp %6 : vector<8x4xf32>
    %cst_5 = arith.constant 1.000000e+00 : f32
    %8 = vector.broadcast %cst_5 : f32 to vector<8x4xf32>
    %9 = arith.addf %8, %7 : vector<8x4xf32>
    %10 = arith.divf %8, %9 : vector<8x4xf32>
    %c0_6 = arith.constant 0 : index
    %c0_7 = arith.constant 0 : index
    %11 = vector.load %arg4[%c0_6, %c0_7] : memref<4x12xf32, #tpu.memory_space<vmem>>, vector<4x12xf32>
    %cst_8 = arith.constant dense<0.000000e+00> : vector<8x12xf32>
    %12 = tpu.matmul %10, %11, %cst_8 {dimension_numbers = #tpu.dot_dimension_numbers<[1], [0], [0], [1], [0, 0, 1, 1], [], []>} : vector<8x4xf32>, vector<4x12xf32>, vector<8x12xf32> -> vector<8x12xf32>
    %c0_9 = arith.constant 0 : index
    %c0_10 = arith.constant 0 : index
    %13 = vector.load %arg5[%c0_9, %c0_10] : memref<1x12xf32, #tpu.memory_space<vmem>>, vector<1x12xf32>
    %14 = vector.broadcast %13 : vector<1x12xf32> to vector<8x12xf32>
    %15 = arith.addf %12, %14 : vector<8x12xf32>
    %16 = arith.negf %15 : vector<8x12xf32>
    %17 = math.exp %16 : vector<8x12xf32>
    %cst_11 = arith.constant 1.000000e+00 : f32
    %18 = vector.broadcast %cst_11 : f32 to vector<8x12xf32>
    %19 = arith.addf %18, %17 : vector<8x12xf32>
    %20 = arith.divf %18, %19 : vector<8x12xf32>
    %c0_12 = arith.constant 0 : index
    %c0_13 = arith.constant 0 : index
    %21 = vector.load %arg6[%c0_12, %c0_13] : memref<12x384xf32, #tpu.memory_space<vmem>>, vector<12x384xf32>
    %cst_14 = arith.constant dense<0.000000e+00> : vector<8x384xf32>
    %22 = tpu.matmul %20, %21, %cst_14 {dimension_numbers = #tpu.dot_dimension_numbers<[1], [0], [0], [1], [0, 0, 1, 1], [], []>} : vector<8x12xf32>, vector<12x384xf32>, vector<8x384xf32> -> vector<8x384xf32>
    %c0_15 = arith.constant 0 : index
    %c0_16 = arith.constant 0 : index
    %23 = vector.load %arg1[%c0_15, %c0_16] : memref<8x384xf32, #tpu.memory_space<vmem>>, vector<8x384xf32>
    %24 = arith.mulf %23, %22 : vector<8x384xf32>
    %c0_17 = arith.constant 0 : index
    %c0_18 = arith.constant 0 : index
    %25 = vector.load %arg7[%c0_17, %c0_18] : memref<8x384xf32, #tpu.memory_space<vmem>>, vector<8x384xf32>
    tpu.vector_store %arg7[%c0_17, %c0_18], %24 {strides = array<i32>} : memref<8x384xf32, #tpu.memory_space<vmem>>, vector<8x384xf32>,
    return
  }
  func.func @transform_0(%arg0: i32) -> (i32, i32) {
    %c0_i32 = arith.constant 0 : i32
    %c0_i32_0 = arith.constant 0 : i32
    return %arg0, %c0_i32 : i32, i32
  }
  func.func @transform_1(%arg0: i32) -> (i32, i32) {
    %c0_i32 = arith.constant 0 : i32
    %c0_i32_0 = arith.constant 0 : i32
    %c0_i32_1 = arith.constant 0 : i32
    return %c0_i32, %c0_i32_0 : i32, i32
  }
  func.func @transform_2(%arg0: i32) -> (i32, i32) {
    %c0_i32 = arith.constant 0 : i32
    %c0_i32_0 = arith.constant 0 : i32
    %c0_i32_1 = arith.constant 0 : i32
    return %c0_i32, %c0_i32_0 : i32, i32
  }
  func.func @transform_3(%arg0: i32) -> (i32, i32) {
    %c0_i32 = arith.constant 0 : i32
    %c0_i32_0 = arith.constant 0 : i32
    %c0_i32_1 = arith.constant 0 : i32
    return %c0_i32, %c0_i32_0 : i32, i32
  }
  func.func @transform_4(%arg0: i32) -> (i32, i32) {
    %c0_i32 = arith.constant 0 : i32
    %c0_i32_0 = arith.constant 0 : i32
    %c0_i32_1 = arith.constant 0 : i32
    return %c0_i32, %c0_i32_0 : i32, i32
  }
  func.func @transform_5(%arg0: i32) -> (i32, i32) {
    %c0_i32 = arith.constant 0 : i32
    %c0_i32_0 = arith.constant 0 : i32
    %c0_i32_1 = arith.constant 0 : i32
    return %c0_i32, %c0_i32_0 : i32, i32
  }
  func.func @transform_6(%arg0: i32) -> (i32, i32) {
    %c0_i32 = arith.constant 0 : i32
    %c0_i32_0 = arith.constant 0 : i32
    return %arg0, %c0_i32 : i32, i32
  }
}

</mosaic_0001>

<bundles_post_ra>
// kernel: tpu_custom_call.1
= control target key start
LH: loop header
LB: loop body
LE: loop exit
PB: predicated region body
PF: predicated region fallthrough
CT: control target
= control target key end

     0   :  { %v718_v7 = vmov 0.0|0.0   ;;  %vm719_vm0 = vmmov 0   ;;  %v720_v8 = vmov 0.0   ;;  %s973_s0 = inlined_call_operand.vmem [shape: f32[8,384], index: 0, kind: input, shape index: {}]   ;;  %s974_s1 = inlined_call_operand.vmem [shape: f32[384,4], index: 1, kind: input, shape index: {}]   ;;  %s975_s2 = inlined_call_operand.vmem [shape: f32[1,4], index: 2, kind: input, shape index: {}]   ;;  %s976_s3 = inlined_call_operand.vmem [shape: f32[4,12], index: 3, kind: input, shape index: {}]   ;;  %s977_s4 = inlined_call_operand.vmem [shape: f32[1,12], index: 4, kind: input, shape index: {}]   ;;  %s978_s5 = inlined_call_operand.vmem [shape: f32[12,384], index: 5, kind: input, shape index: {}]   ;;  %s979_s6 = inlined_call_operand.hbm [shape: f32[8,384], index: 6, kind: output, shape index: {}]  }
   0x1   :  { %v43_v0 = vld [vmem:[%s974_s1 + $0x80] sm:$0xff]  ;;  %v44_v1 = vld [vmem:[%s974_s1 + $0x88] sm:$0xff]  ;;  %v45_v5 = vld [vmem:[%s974_s1 + $0x90] sm:$0xff]  ;;  %647 = vmatprep.subr.bf16.mxu1 %v718_v7  ;;  %600 = vmatprep.mubr.msk.f32.mxu1 %vm719_vm0, %v720_v8 }
   0x2   :  { %v27_v2 = vld [vmem:[%s974_s1] sm:$0xff]  ;;  %v615_v3 = vpack.c.bf16 %v44_v1, %v43_v0  ;;  %v28_v4 = vld [vmem:[%s974_s1 + $0x8] sm:$0xff]  ;;  %v46_v6 = vld [vmem:[%s974_s1 + $0x98] sm:$0xff] }
   0x3   :  { %v617_v9 = vpack.c.bf16 %v28_v4, %v27_v2  ;;  %v619_v10 = vpack.c.bf16 %v46_v6, %v45_v5  ;;  %v29_v11 = vld [vmem:[%s974_s1 + $0x10] sm:$0xff]  ;;  %v30_v12 = vld [vmem:[%s974_s1 + $0x18] sm:$0xff]  ;;  %v59_v13 = vld [vmem:[%s974_s1 + $0x100] sm:$0xff] }
   0x4   :  { %616 = vmatprep.subr.bf16.mxu0 %v615_v3  ;;  %v60_v14 = vld [vmem:[%s974_s1 + $0x108] sm:$0xff]  ;;  %v47_v15 = vld [vmem:[%s974_s1 + $0xa0] sm:$0xff]  ;;  %v621_v17 = vpack.c.bf16 %v30_v12, %v29_v11  ;;  %v61_v19 = vld [vmem:[%s974_s1 + $0x110] sm:$0xff] }
   0x5   :  { %v48_v16 = vld [vmem:[%s974_s1 + $0xa8] sm:$0xff]  ;;  %618 = vmatpush3.bf16.msra.mxu0 %v617_v9  ;;  %v648_v18 = vpack.c.bf16 %v60_v14, %v59_v13  ;;  %v31_v21 = vld [vmem:[%s974_s1 + $0x20] sm:$0xff]  ;;  %v62_v23 = vld [vmem:[%s974_s1 + $0x118] sm:$0xff] }
   0x6   :  { %620 = vmatprep.subr.bf16.mxu0 %v619_v10  ;;  %v623_v20 = vpack.c.bf16 %v48_v16, %v47_v15  ;;  %v32_v22 = vld [vmem:[%s974_s1 + $0x28] sm:$0xff]  ;;  %v651_v24 = vpack.c.bf16 %v62_v23, %v61_v19  ;;  %v49_v25 = vld [vmem:[%s974_s1 + $0xb0] sm:$0xff]  ;;  %v50_v26 = vld [vmem:[%s974_s1 + $0xb8] sm:$0xff] }
   0x7   :  { %649 = vmatpush3.bf16.msra.mxu1 %v648_v18  ;;  %v63_v27 = vld [vmem:[%s974_s1 + $0x120] sm:$0xff]  ;;  %v64_v28 = vld [vmem:[%s974_s1 + $0x128] sm:$0xff]  ;;  %v625_v29 = vpack.c.bf16 %v32_v22, %v31_v21  ;;  %v627_v30 = vpack.c.bf16 %v50_v26, %v49_v25  ;;  %v33_v31 = vld [vmem:[%s974_s1 + $0x30] sm:$0xff] }
   0x8   :  { %650 = vmatprep.subr.bf16.mxu1 %v718_v7  ;;  %v34_v32 = vld [vmem:[%s974_s1 + $0x38] sm:$0xff]  ;;  %v654_v33 = vpack.c.bf16 %v64_v28, %v63_v27  ;;  %v51_v34 = vld [vmem:[%s974_s1 + $0xc0] sm:$0xff]  ;;  %v52_v35 = vld [vmem:[%s974_s1 + $0xc8] sm:$0xff] }
   0x9   :  { %622 = vmatpush3.bf16.msra.mxu0 %v621_v17  ;;  %v65_v36 = vld [vmem:[%s974_s1 + $0x130] sm:$0xff]  ;;  %v66_v37 = vld [vmem:[%s974_s1 + $0x138] sm:$0xff]  ;;  %v629_v38 = vpack.c.bf16 %v34_v32, %v33_v31  ;;  %v631_v39 = vpack.c.bf16 %v52_v35, %v51_v34  ;;  %v35_v40 = vld [vmem:[%s974_s1 + $0x40] sm:$0xff] }
   0xa   :  { %624 = vmatprep.subr.bf16.mxu0 %v623_v20  ;;  %v36_v41 = vld [vmem:[%s974_s1 + $0x48] sm:$0xff]  ;;  %v657_v42 = vpack.c.bf16 %v66_v37, %v65_v36  ;;  %v53_v43 = vld [vmem:[%s974_s1 + $0xd0] sm:$0xff]  ;;  %v54_v44 = vld [vmem:[%s974_s1 + $0xd8] sm:$0xff] }
   0xb   :  { %652 = vmatpush3.bf16.msra.mxu1 %v651_v24  ;;  %v67_v45 = vld [vmem:[%s974_s1 + $0x140] sm:$0xff]  ;;  %v68_v46 = vld [vmem:[%s974_s1 + $0x148] sm:$0xff]  ;;  %v633_v48 = vpack.c.bf16 %v36_v41, %v35_v40  ;;  %v635_v49 = vpack.c.bf16 %v54_v44, %v53_v43  ;;  %v37_v50 = vld [vmem:[%s974_s1 + $0x50] sm:$0xff] }
   0xc   :  { %653 = vmatprep.subr.bf16.mxu1 %v718_v7  ;;  %v863_v47 = vld [vmem:[%s973_s0 + $0x8] sm:$0xff]  ;;  %v38_v51 = vld [vmem:[%s974_s1 + $0x58] sm:$0xff] }
   0xd   :  { %626 = vmatpush3.bf16.msra.mxu0 %v625_v29  ;;  %146 = vmatprep.mubr.f32.mxu0 %v863_v47 }
   0xe   :  { %628 = vmatprep.subr.bf16.mxu0 %v627_v30 }
   0xf   :  { %655 = vmatpush3.bf16.msra.mxu1 %v654_v33 }
  0x10   :  { %656 = vmatprep.subr.bf16.mxu1 %v718_v7 }
  0x11   :  { %630 = vmatpush3.bf16.msra.mxu0 %v629_v38 }
  0x12   :  { %632 = vmatprep.subr.bf16.mxu0 %v631_v39 }
  0x13   :  { %11 = vsyncpa [#allocation3], 0  ;;  %658 = vmatpush3.bf16.msra.mxu1 %v657_v42  ;;  %v660_v52 = vpack.c.bf16 %v68_v46, %v67_v45  ;;  %v55_v53 = vld [vmem:[%s974_s1 + $0xe0] sm:$0xff]  ;;  %v56_v54 = vld [vmem:[%s974_s1 + $0xe8] sm:$0xff]  ;;  %v637_v57 = vpack.c.bf16 %v38_v51, %v37_v50  ;;  %vm240_vm1 = vcmask 1043456   ;;  %vm236_vm2 = vcmask 31744  }
  0x14   :  { %659 = vmatprep.subr.bf16.mxu1 %v718_v7  ;;  %v69_v55 = vld [vmem:[%s974_s1 + $0x150] sm:$0xff]  ;;  %v70_v56 = vld [vmem:[%s974_s1 + $0x158] sm:$0xff]  ;;  %v639_v58 = vpack.c.bf16 %v56_v54, %v55_v53  ;;  %v39_v59 = vld [vmem:[%s974_s1 + $0x60] sm:$0xff]  ;;  %vm721_vm3 = vmmov 1   ;;  %vm326_vm5 = vcmask 97280  }
  0x15   :  { %634 = vmatpush3.bf16.msra.mxu0 %v633_v48  ;;  %v40_v60 = vld [vmem:[%s974_s1 + $0x68] sm:$0xff]  ;;  %v663_v61 = vpack.c.bf16 %v70_v56, %v69_v55  ;;  %v57_v62 = vld [vmem:[%s974_s1 + $0xf0] sm:$0xff]  ;;  %v58_v63 = vld [vmem:[%s974_s1 + $0xf8] sm:$0xff] }
  0x16   :  { %636 = vmatprep.subr.bf16.mxu0 %v635_v49  ;;  %v71_v0 = vld [vmem:[%s974_s1 + $0x160] sm:$0xff]  ;;  %v72_v1 = vld [vmem:[%s974_s1 + $0x168] sm:$0xff]  ;;  %v641_v2 = vpack.c.bf16 %v40_v60, %v39_v59  ;;  %v643_v3 = vpack.c.bf16 %v58_v63, %v57_v62  ;;  %v41_v4 = vld [vmem:[%s974_s1 + $0x70] sm:$0xff] }
  0x17   :  { %661 = vmatpush3.bf16.msra.mxu1 %v660_v52  ;;  %v42_v5 = vld [vmem:[%s974_s1 + $0x78] sm:$0xff]  ;;  %v666_v6 = vpack.c.bf16 %v72_v1, %v71_v0  ;;  %v73_v9 = vld [vmem:[%s974_s1 + $0x170] sm:$0xff]  ;;  %v24_v13 = vld [vmem:[%s973_s0] sm:$0xff] }
  0x18   :  { %662 = vmatprep.subr.bf16.mxu1 %v718_v7  ;;  %v74_v10 = vld [vmem:[%s974_s1 + $0x178] sm:$0xff]  ;;  %v645_v11 = vpack.c.bf16 %v42_v5, %v41_v4  ;;  %v26_v14 = vld [vmem:[%s973_s0 + $0x10] sm:$0xff]  ;;  %v228_v15 = vld [vmem:[%s976_s3] sm:$0xf] }
  0x19   :  { %638 = vmatpush3.bf16.msra.mxu0 %v637_v57  ;;  %v669_v12 = vpack.c.bf16 %v74_v10, %v73_v9  ;;  %v500_v18 = vld [vmem:[%s975_s2] ss:$0 sm:$0xff]  ;;  %vm672_vm4 = vmpackc.low %vm240_vm1, %vm721_vm3  ;;  %v322_v31 = vld [vmem:[%s978_s5 + $0x10] sm:$0xff] }
  0x1a   :  { %640 = vmatprep.subr.bf16.mxu0 %v639_v58  ;;  %v324_v28 = vld [vmem:[%s978_s5 + $0x20] sm:$0xf]  ;;  %v325_v33 = vld [vmem:[%s978_s5 + $0x28] sm:$0xf] }
  0x1b   :  { %664 = vmatpush3.bf16.msra.mxu1 %v663_v61  ;;  %v320_v29 = vld [vmem:[%s978_s5] sm:$0xff]  ;;  %v678_v34 = vpack.c.bf16 %v325_v33, %v322_v31 }
  0x1c   :  { %665 = vmatprep.subr.bf16.mxu1 %v718_v7  ;;  %v502_v35 = vld [vmem:[%s977_s4] ss:$0 sm:$0xff] }
  0x1d   :  { %642 = vmatpush3.bf16.msra.mxu0 %v641_v2 }
  0x1e   :  { %644 = vmatprep.subr.bf16.mxu0 %v643_v3 }
  0x1f   :  { %667 = vmatpush3.bf16.msra.mxu1 %v666_v6 }
  0x20   :  { %668 = vmatprep.subr.bf16.mxu1 %v718_v7 }
  0x21   :  { %646 = vmatpush3.bf16.msra.mxu0 %v645_v11 }
  0x22   :  { %603 = vmatprep.subr.mxu0 %v720_v8 }
  0x23   :  { %670 = vmatpush3.bf16.msra.mxu1 %v669_v12 }
  0x24   :  { %147 = vmatmul.mubr.f32.vlgmr.msra.gmra.mrb[0].mxu0 %v24_v13 }
  0x25   :  { %605 = vmatprep.mubr.msk.f32.mxu0 %vm719_vm0, %v720_v8  ;;  %604 = vmatpush3.msk.msra.mxu0 %vm240_vm1, %v228_v15 }
  0x26   :  { %601 = vmatmul.mubr.f32.vlgmr.msra.gmra.mrb[0].mxu1 %v26_v14  ;;  %677 = vmatprep.subr.bf16.mxu0 %v718_v7  ;;  %v321_v7 = vld [vmem:[%s978_s5 + $0x8] sm:$0xff] }
  0x27   :  { %403 = vmatprep.mubr.f32.mxu1 %v720_v8  ;;  %v671_v30 = vpack.c.bf16 %v324_v28, %v321_v7 }
  0x29   :  { %673 = vmatprep.subr.msk.bf16.mxu1 %vm672_vm4, %v671_v30 }
  0xf7   :  { %v543_v16 = vpop.f32.mrb[0].mxu0 }
  0xf8   :  { %v544_v17 = vpop.f32.mrb[1].mxu0 }
  0xf9   :  { %v545_v19 = vadd.f32 %v544_v17, %v543_v16  ;;  %v218_v20 = vpop.f32.mrb[0].mxu1 }
  0xfa   :  { %v602_v21 = vpop.f32.mrb[1].mxu1 }
  0xfb   :  { %v149_v22 = vadd.f32 %v545_v19, %v500_v18 }
  0xfd   :  { %v219_v23 = vadd.f32 %v218_v20, %v149_v22 }
  0xff   :  { %v501_v24 = vmul.f32 -1.442695, %v219_v23 }
 0x101   :  { %686 = vpow2.f32 %v501_v24 }
 0x10b   :  { %v687_v25 = vpop.eup %686 }
 0x10c   :  { %v225_v26 = vadd.f32 1.0, %v687_v25 }
 0x10e   :  { %688 = vrcp.f32 %v225_v26 }
 0x118   :  { %v689_v27 = vpop.eup %688 }
 0x119   :  { %606 = vmatmul.mubr.msk.f32.vlgmr.msra.gmra.mrb[2].mxu0 %vm236_vm2, %v689_v27 }
 0x11a   :  { %612 = vmatprep.mubr.msk.f32.mxu0 %vm719_vm0, %v720_v8  ;;  %v323_v8 = vld [vmem:[%s978_s5 + $0x18] sm:$0xf]  ;;  %680 = vmatpush3.bf16.msk.msra.mxu0 %vm672_vm4, %v678_v34  ;;  %s722_s5 = smov [#allocation2]  }
 0x11b   :  { %v674_v32 = vpack.c.bf16 %v323_v8, %v320_v29  ;;  %s492_s17 = sshll.u32 %s722_s5, 4  ;;  %s493_s17 = int_to_ptr.vmem [resolvable:$true] %s492_s17 }
 0x11c   :  { %s694_s4 = scalar_lea.vmem %s493_s17, 384  ;;  %p699_p1 = scmp.lt.s32.totalorder %s493_s17, %s493_s17 }
 0x11d   :  { %676 = vmatpush1.bf16.msk.msra.mxu1 %vm672_vm4, %v674_v32  ;;  %p695_p0 = scmp.ne.s32.totalorder %s493_s17, %s694_s4  ;;  %p700_p2 = scmp.lt.s32.totalorder %s694_s4, %s694_s4 }
 0x11f   :  { %p701_p3 = por %p700_p2, %p699_p1 }
 0x121   :  { %p702_p4 = pnand %p701_p3, %p695_p0 }
 0x1ec   :  { %v310_v36 = vpop.f32.mrb[2].mxu0 }
 0x1ed   :  { %v311_v37 = vadd.f32 %v502_v35, %v310_v36  ;;  %v607_v38 = vpop.f32.mrb[3].mxu0 }
 0x1ef   :  { %v505_v39 = vmul.f32 -1.442695, %v311_v37 }
 0x1f1   :  { %690 = vpow2.f32 %v505_v39 }
 0x1fb   :  { %v691_v40 = vpop.eup %690 }
 0x1fc   :  { %v317_v41 = vadd.f32 1.0, %v691_v40 }
 0x1fe   :  { %692 = vrcp.f32 %v317_v41 }
 0x208   :  { %v693_v42 = vpop.eup %692 }
 0x209   :  { %508 = vmatmul.mubr.msk.f32.vlgmr.msra.gmra.mrb[2].mxu1 %vm326_vm5, %v693_v42  ;;  %613 = vmatmul.mubr.msk.f32.vlgmr.msra.gmra.mrb[4].mxu0 %vm326_vm5, %v693_v42 }
 0x2dc   :  { %v405_v43 = vpop.f32.mrb[2].mxu1  ;;  %v476_v44 = vpop.f32.mrb[4].mxu0 }
 0x2dd   :  { %v480_v45 = vmul.f32 %v405_v43, %v24_v13  ;;  %v482_v46 = vmul.f32 %v476_v44, %v26_v14  ;;  %v407_v48 = vpop.f32.mrb[3].mxu1  ;;  %v614_v49 = vpop.f32.mrb[5].mxu0 }
 0x2de   :  { %v481_v50 = vmul.f32 %v407_v48, %v863_v47 }
 0x2df   :  { %483 = vst [vmem:[#allocation2] sm:$0xff] %v480_v45  ;;  %485 = vst [vmem:[#allocation2 + $0x10] sm:$0xff] %v482_v46 }
 0x2e0   :  { %484 = vst [vmem:[#allocation2 + $0x8] sm:$0xff] %v481_v50 }
 0x2e1   :  { %705 = shalt.err (!%p702_p4)
}
 0x2e2   :  { %s706_s20 = scalar_lea.hbm %s979_s6, 384 }
 0x2e3   :  { %p707_p5 = scmp.ne.s32.totalorder %s979_s6, %s706_s20  ;;  %p710_p6 = scmp.lt.u32.totalorder %s706_s20, %s979_s6 }
 0x2e5   :  { %p712_p7 = pnand %p710_p6, %p707_p5 }
 0x2e7   :  { %715 = shalt.err (!%p712_p7)
}
 0x2e8   :  { %495 = dma.vmem_to_hbm [thread:$0]  %s493_s17, 384, %s979_s6, [#allocation3]  }
 0x2e9   :  { %716 = dma.done.wait [#allocation3], 384  }
 0x2ea   :  { %717 = vsyncadd [#allocation3], 4294966912 }
 0x2eb   :  { %499 = vsyncpa [#allocation3], 1 }

</bundles_post_ra>
